<compile_context>
chip_gen: v7x
topology: tpu7x:2x2x1
jax: 0.10.0
libtpu: 0.0.40
codegen_flags: <defaults>
</compile_context>

<pallas_src>
import math

import jax
import jax.numpy as jnp
from jax.experimental import pallas as pl
from jax.experimental.pallas import tpu as pltpu

BN_EPS = 1e-5
HIDDEN = 64
LANES = 128


def _round_up8(n):
    return -(-n // 8) * 8


# ----------------------------------------------------------------------------
# Fused Pallas kernel: the entire Encoder.forward in one body.
#   inputs : x (B, in), eps (B, L), w_slab (in_pad+256, 128), aux_slab (4, 128)
#   output : packed (B, 3L) = [mu | log_var | z]
# ----------------------------------------------------------------------------
def _encoder_kernel(x_ref, eps_ref, w_ref, aux_ref, out_ref):
    in_size = x_ref.shape[1]
    L = eps_ref.shape[1]
    in_pad = _round_up8(in_size)

    x = x_ref[...]
    eps = eps_ref[...]

    # Static slices of the packed weight slab (sublane-aligned, zero cost).
    w1 = w_ref[pl.ds(0, in_size), :]              # (in, 128)
    w2 = w_ref[pl.ds(in_pad, LANES), :]           # (128, 128)
    wms = w_ref[pl.ds(in_pad + LANES, LANES), :]  # (128, 128)

    aux = aux_ref[...]                            # (4, 128)
    b1 = aux[0:1, :]
    gamma = aux[1:2, :]
    beta = aux[2:3, :]
    b_ms = aux[3:4, :]

    # enc_1 -> ReLU  (padded lanes stay exactly 0: zero weight cols, zero bias)
    h1 = jnp.maximum(
        jnp.dot(x, w1, preferred_element_type=jnp.float32) + b1, 0.0)

    # enc_2 — bias b2 omitted: cancelled by training-mode BN mean subtraction.
    h2 = jnp.dot(h1, w2, preferred_element_type=jnp.float32)

    # BatchNorm1d (training mode, biased batch variance), folded to scale/shift.
    mean = jnp.mean(h2, axis=0, keepdims=True)
    var = jnp.mean((h2 - mean) ** 2, axis=0, keepdims=True)     # two-pass
    s = gamma * jax.lax.rsqrt(var + BN_EPS)       # padded lanes: gamma=0 -> s=0
    t = beta - mean * s
    h = jnp.maximum(h2 * s + t, 0.0)

    # Packed {mu | log_var} head: one lane-dense matmul.
    head = jnp.dot(h, wms, preferred_element_type=jnp.float32) + b_ms  # (B,128)

    # Reparameterization: exp on the full packed tile (EUP), then one FMA.
    e = jnp.exp(0.5 * head)
    z = head[:, :L] + e[:, L:2 * L] * eps

    # Single lane-packed output slab: [mu | log_var | z].
    out_ref[...] = jnp.concatenate([head[:, :2 * L], z], axis=-1)


# ----------------------------------------------------------------------------
# Wrapper: one pallas_call, full-array VMEM specs, no grid.
# ----------------------------------------------------------------------------
def encoder_forward(packed, x, eps):
    batch = x.shape[0]
    latent = eps.shape[1]

    vmem = lambda: pl.BlockSpec(memory_space=pltpu.MemorySpace.VMEM)

    out = pl.pallas_call(
        _encoder_kernel,
        out_shape=jax.ShapeDtypeStruct((batch, 3 * latent), jnp.float32),
        in_specs=[vmem(), vmem(), vmem(), vmem()],
        out_specs=vmem(),
    )(x, eps, packed["w_slab"], packed["aux_slab"])

    mu = out[:, :latent]
    log_var = out[:, latent:2 * latent]
    z = out[:, 2 * latent:]
    return z, mu, log_var


# ----------------------------------------------------------------------------
# Parameter init (torch.nn.Linear default U(-1/sqrt(in_f), +1/sqrt(in_f))),
# weights pre-transposed as (in_features, out_features): y = x @ W + b.
# ----------------------------------------------------------------------------
def _init_linear(key, in_f, out_f):
    kw, kb = jax.random.split(key)
    bound = 1.0 / math.sqrt(in_f)
    w = jax.random.uniform(kw, (in_f, out_f), jnp.float32, -bound, bound)
    b = jax.random.uniform(kb, (1, out_f), jnp.float32, -bound, bound)
    return w, b


def init_encoder(key, input_size, latent_space):
    k1, k2, km, ks = jax.random.split(key, 4)
    w1, b1 = _init_linear(k1, input_size, HIDDEN)
    w2, b2 = _init_linear(k2, HIDDEN, HIDDEN)
    w_mu, b_mu = _init_linear(km, HIDDEN, latent_space)
    w_sig, b_sig = _init_linear(ks, HIDDEN, latent_space)
    return {
        "w1": w1, "b1": b1,
        "w2": w2, "b2": b2,
        "gamma": jnp.ones((1, HIDDEN), jnp.float32),   # fresh BatchNorm1d
        "beta": jnp.zeros((1, HIDDEN), jnp.float32),
        "w_mu": w_mu, "b_mu": b_mu,
        "w_sig": w_sig, "b_sig": b_sig,
    }


def pack_params(p, input_size, latent_space):
    """Pack all parameters into two lane-dense VMEM slabs (done once)."""
    in_pad = _round_up8(input_size)

    w1p = jnp.zeros((in_pad, LANES), jnp.float32)
    w1p = w1p.at[:input_size, :HIDDEN].set(p["w1"])
    w2p = jnp.zeros((LANES, LANES), jnp.float32)
    w2p = w2p.at[:HIDDEN, :HIDDEN].set(p["w2"])
    wms = jnp.concatenate([p["w_mu"], p["w_sig"]], axis=1)      # (64, 2L)
    wmsp = jnp.zeros((LANES, LANES), jnp.float32)
    wmsp = wmsp.at[:HIDDEN, :2 * latent_space].set(wms)
    w_slab = jnp.concatenate([w1p, w2p, wmsp], axis=0)          # (in_pad+256, 128)

    def row(v):
        return jnp.zeros((1, LANES), jnp.float32).at[:, :v.shape[1]].set(v)

    b_ms = jnp.concatenate([p["b_mu"], p["b_sig"]], axis=1)
    aux_slab = jnp.concatenate(
        [row(p["b1"]), row(p["gamma"]), row(p["beta"]), row(b_ms)], axis=0)
    # b2 intentionally not packed (cancelled by training-mode BatchNorm).
    return {"w_slab": w_slab, "aux_slab": aux_slab}


# ----------------------------------------------------------------------------
# Pure-JAX reference (faithful to the PyTorch module, keeps b2 / unfolded BN).
# ----------------------------------------------------------------------------
def encoder_reference(p, x, eps):
    h1 = jnp.maximum(x @ p["w1"] + p["b1"], 0.0)
    h2 = h1 @ p["w2"] + p["b2"]
    mean = jnp.mean(h2, axis=0, keepdims=True)
    var = jnp.mean((h2 - mean) ** 2, axis=0, keepdims=True)
    h = (h2 - mean) / jnp.sqrt(var + BN_EPS)
    h = jnp.maximum(h * p["gamma"] + p["beta"], 0.0)
    mu = h @ p["w_mu"] + p["b_mu"]
    log_var = h @ p["w_sig"] + p["b_sig"]
    z = mu + jnp.exp(0.5 * log_var) * eps
    return z, mu, log_var


# ----------------------------------------------------------------------------
if __name__ == "__main__":
    BATCH = 8
    INPUT_SIZE = 16
    LATENT_SPACE = 8

    root = jax.random.PRNGKey(0)
    k_params, k_x, k_eps = jax.random.split(root, 3)

    raw = init_encoder(k_params, INPUT_SIZE, LATENT_SPACE)
    packed = pack_params(raw, INPUT_SIZE, LATENT_SPACE)

    x = jax.random.normal(k_x, (BATCH, INPUT_SIZE), jnp.float32)
    # torch uses torch.randn inside forward; here eps is a deterministic input.
    eps = jax.random.normal(k_eps, (BATCH, LATENT_SPACE), jnp.float32)

    z, mu, log_var = jax.block_until_ready(
        jax.jit(encoder_forward)(packed, x, eps))

    # Shape / sanity checks.
    assert z.shape == (BATCH, LATENT_SPACE)
    assert mu.shape == (BATCH, LATENT_SPACE)
    assert log_var.shape == (BATCH, LATENT_SPACE)
    assert bool(jnp.all(jnp.isfinite(z)))
    assert bool(jnp.all(jnp.isfinite(mu)))
    assert bool(jnp.all(jnp.isfinite(log_var)))

    # Numerical check against the PyTorch-faithful pure-JAX reference.
    z_r, mu_r, lv_r = encoder_reference(raw, x, eps)
    assert bool(jnp.allclose(mu, mu_r, atol=1e-4, rtol=1e-4))
    assert bool(jnp.allclose(log_var, lv_r, atol=1e-4, rtol=1e-4))
    assert bool(jnp.allclose(z, z_r, atol=1e-4, rtol=1e-4))

    print("KERNEL_OK")
</pallas_src>

<mosaic_0001>
module attributes {stable_mosaic.version = 11 : i64} {
  func.func @_encoder_kernel(%arg0: memref<8x16xf32, #tpu.memory_space<vmem>>, %arg1: memref<8x8xf32, #tpu.memory_space<vmem>>, %arg2: memref<272x128xf32, #tpu.memory_space<vmem>>, %arg3: memref<4x128xf32, #tpu.memory_space<vmem>>, %arg4: memref<8x24xf32, #tpu.memory_space<vmem>>) attributes {dimension_semantics = [], scalar_prefetch = 0 : i64, scratch_operands = 0 : i64, tpu.core_type = #tpu.core_type<tc>} {
    %c0 = arith.constant 0 : index
    %c0_0 = arith.constant 0 : index
    %0 = vector.load %arg0[%c0, %c0_0] : memref<8x16xf32, #tpu.memory_space<vmem>>, vector<8x16xf32>
    %c0_1 = arith.constant 0 : index
    %c0_2 = arith.constant 0 : index
    %1 = vector.load %arg1[%c0_1, %c0_2] : memref<8x8xf32, #tpu.memory_space<vmem>>, vector<8x8xf32>
    %c0_3 = arith.constant 0 : index
    %c0_4 = arith.constant 0 : index
    %2 = vector.load %arg2[%c0_3, %c0_4] : memref<272x128xf32, #tpu.memory_space<vmem>>, vector<16x128xf32>
    %c16 = arith.constant 16 : index
    %c0_5 = arith.constant 0 : index
    %3 = vector.load %arg2[%c16, %c0_5] : memref<272x128xf32, #tpu.memory_space<vmem>>, vector<128x128xf32>
    %c144 = arith.constant 144 : index
    %c0_6 = arith.constant 0 : index
    %4 = vector.load %arg2[%c144, %c0_6] : memref<272x128xf32, #tpu.memory_space<vmem>>, vector<128x128xf32>
    %c0_7 = arith.constant 0 : index
    %c0_8 = arith.constant 0 : index
    %5 = vector.load %arg3[%c0_7, %c0_8] : memref<4x128xf32, #tpu.memory_space<vmem>>, vector<4x128xf32>
    %6 = vector.extract_strided_slice %5 {offsets = [0, 0], sizes = [1, 128], strides = [1, 1]} : vector<4x128xf32> to vector<1x128xf32>
    %7 = vector.extract_strided_slice %5 {offsets = [1, 0], sizes = [1, 128], strides = [1, 1]} : vector<4x128xf32> to vector<1x128xf32>
    %8 = vector.extract_strided_slice %5 {offsets = [2, 0], sizes = [1, 128], strides = [1, 1]} : vector<4x128xf32> to vector<1x128xf32>
    %9 = vector.extract_strided_slice %5 {offsets = [3, 0], sizes = [1, 128], strides = [1, 1]} : vector<4x128xf32> to vector<1x128xf32>
    %cst = arith.constant dense<0.000000e+00> : vector<8x128xf32>
    %10 = tpu.matmul %0, %2, %cst {dimension_numbers = #tpu.dot_dimension_numbers<[1], [0], [0], [1], [0, 0, 1, 1], [], []>} : vector<8x16xf32>, vector<16x128xf32>, vector<8x128xf32> -> vector<8x128xf32>
    %11 = vector.broadcast %6 : vector<1x128xf32> to vector<8x128xf32>
    %12 = arith.addf %10, %11 : vector<8x128xf32>
    %cst_9 = arith.constant 0.000000e+00 : f32
    %13 = vector.broadcast %cst_9 : f32 to vector<8x128xf32>
    %14 = arith.maximumf %12, %13 : vector<8x128xf32>
    %cst_10 = arith.constant dense<0.000000e+00> : vector<8x128xf32>
    %15 = tpu.matmul %14, %3, %cst_10 {dimension_numbers = #tpu.dot_dimension_numbers<[1], [0], [0], [1], [0, 0, 1, 1], [], []>} : vector<8x128xf32>, vector<128x128xf32>, vector<8x128xf32> -> vector<8x128xf32>
    %cst_11 = arith.constant dense<0.000000e+00> : vector<128xf32>
    %16 = vector.multi_reduction <add>, %15, %cst_11 [0] : vector<8x128xf32> to vector<128xf32>
    %17 = vector.shape_cast %16 : vector<128xf32> to vector<1x128xf32>
    %cst_12 = arith.constant 8.000000e+00 : f32
    %18 = vector.broadcast %cst_12 : f32 to vector<1x128xf32>
    %19 = arith.divf %17, %18 : vector<1x128xf32>
    %20 = vector.broadcast %19 : vector<1x128xf32> to vector<8x128xf32>
    %21 = arith.subf %15, %20 : vector<8x128xf32>
    %22 = arith.mulf %21, %21 : vector<8x128xf32>
    %cst_13 = arith.constant dense<0.000000e+00> : vector<128xf32>
    %23 = vector.multi_reduction <add>, %22, %cst_13 [0] : vector<8x128xf32> to vector<128xf32>
    %24 = vector.shape_cast %23 : vector<128xf32> to vector<1x128xf32>
    %cst_14 = arith.constant 8.000000e+00 : f32
    %25 = vector.broadcast %cst_14 : f32 to vector<1x128xf32>
    %26 = arith.divf %24, %25 : vector<1x128xf32>
    %cst_15 = arith.constant 9.99999974E-6 : f32
    %27 = vector.broadcast %cst_15 : f32 to vector<1x128xf32>
    %28 = arith.addf %26, %27 : vector<1x128xf32>
    %29 = math.rsqrt %28 : vector<1x128xf32>
    %30 = arith.mulf %7, %29 : vector<1x128xf32>
    %31 = arith.mulf %19, %30 : vector<1x128xf32>
    %32 = arith.subf %8, %31 : vector<1x128xf32>
    %33 = vector.broadcast %30 : vector<1x128xf32> to vector<8x128xf32>
    %34 = arith.mulf %15, %33 : vector<8x128xf32>
    %35 = vector.broadcast %32 : vector<1x128xf32> to vector<8x128xf32>
    %36 = arith.addf %34, %35 : vector<8x128xf32>
    %cst_16 = arith.constant 0.000000e+00 : f32
    %37 = vector.broadcast %cst_16 : f32 to vector<8x128xf32>
    %38 = arith.maximumf %36, %37 : vector<8x128xf32>
    %cst_17 = arith.constant dense<0.000000e+00> : vector<8x128xf32>
    %39 = tpu.matmul %38, %4, %cst_17 {dimension_numbers = #tpu.dot_dimension_numbers<[1], [0], [0], [1], [0, 0, 1, 1], [], []>} : vector<8x128xf32>, vector<128x128xf32>, vector<8x128xf32> -> vector<8x128xf32>
    %40 = vector.broadcast %9 : vector<1x128xf32> to vector<8x128xf32>
    %41 = arith.addf %39, %40 : vector<8x128xf32>
    %cst_18 = arith.constant 5.000000e-01 : f32
    %42 = vector.broadcast %cst_18 : f32 to vector<8x128xf32>
    %43 = arith.mulf %42, %41 : vector<8x128xf32>
    %44 = math.exp %43 : vector<8x128xf32>
    %45 = vector.extract_strided_slice %41 {offsets = [0, 0], sizes = [8, 8], strides = [1, 1]} : vector<8x128xf32> to vector<8x8xf32>
    %46 = vector.extract_strided_slice %44 {offsets = [0, 8], sizes = [8, 8], strides = [1, 1]} : vector<8x128xf32> to vector<8x8xf32>
    %47 = arith.mulf %46, %1 : vector<8x8xf32>
    %48 = arith.addf %45, %47 : vector<8x8xf32>
    %49 = vector.extract_strided_slice %41 {offsets = [0, 0], sizes = [8, 16], strides = [1, 1]} : vector<8x128xf32> to vector<8x16xf32>
    %50 = tpu.concatenate %49, %48 in 1 : vector<8x16xf32>, vector<8x8xf32> -> vector<8x24xf32>
    %c0_19 = arith.constant 0 : index
    %c0_20 = arith.constant 0 : index
    %51 = vector.load %arg4[%c0_19, %c0_20] : memref<8x24xf32, #tpu.memory_space<vmem>>, vector<8x24xf32>
    tpu.vector_store %arg4[%c0_19, %c0_20], %50 {strides = array<i32>} : memref<8x24xf32, #tpu.memory_space<vmem>>, vector<8x24xf32>,
    return
  }
}

</mosaic_0001>

<bundles_post_ra>
// kernel: encoder_forward.1
= control target key start
LH: loop header
LB: loop body
LE: loop exit
PB: predicated region body
PF: predicated region fallthrough
CT: control target
= control target key end

     0   :  { %9 = vsyncpa [#allocation3], 0  ;;  %s739_s0 = inlined_call_operand.hbm [shape: f32[8,16], index: 0, kind: input, shape index: {}]   ;;  %s740_s1 = inlined_call_operand.vmem [shape: f32[8,8], index: 1, kind: input, shape index: {}]   ;;  %s741_s2 = inlined_call_operand.hbm [shape: f32[272,128], index: 2, kind: input, shape index: {}]   ;;  %s742_s3 = inlined_call_operand.hbm [shape: f32[4,128], index: 3, kind: input, shape index: {}]   ;;  %s743_s4 = inlined_call_operand.vmem [shape: f32[8,24], index: 4, kind: output, shape index: {}]  }
   0x1   :  { %10 = vsyncpa [#allocation5], 0  ;;  %s626_s15 = smov [#allocation4]   ;;  %s556_s19 = scalar_lea.hbm %s741_s2, 4352 }
   0x2   :  { %s28_s16 = sshll.u32 %s626_s15, 4  ;;  %p557_p0 = scmp.ne.s32.totalorder %s741_s2, %s556_s19  ;;  %s29_s16 = int_to_ptr.vmem [resolvable:$true] %s28_s16 }
   0x3   :  { %p560_p1 = scmp.lt.u32.totalorder %s556_s19, %s741_s2 }
   0x5   :  { %p562_p2 = pnand %p560_p1, %p557_p0 }
   0x7   :  { %565 = shalt.err (!%p562_p2)
}
   0x8   :  { %s566_s24 = scalar_lea.vmem %s29_s16, 4352  ;;  %p571_p4 = scmp.lt.s32.totalorder %s29_s16, %s29_s16 }
   0x9   :  { %p567_p3 = scmp.ne.s32.totalorder %s29_s16, %s566_s24  ;;  %p572_p5 = scmp.lt.s32.totalorder %s566_s24, %s566_s24 }
   0xb   :  { %p573_p6 = por %p572_p5, %p571_p4 }
   0xd   :  { %p574_p7 = pnand %p573_p6, %p567_p3 }
   0xf   :  { %577 = shalt.err (!%p574_p7)
}
  0x10   :  { %s627_s25 = smov 128   ;;  %s628_s26 = smov 8  }
  0x11   :  { %34 = dma.hbm_to_vmem [thread:$0]  %s741_s2, 4352, %s29_s16, [#allocation5], %s627_s25, %s627_s25, %s628_s26  }
  0x12   :  { %s629_s29 = smov [#allocation2]   ;;  %s630_s5 = smov [#allocation6]  }
  0x13   :  { %s17_s30 = sshll.u32 %s629_s29, 4  ;;  %s41_s6 = sshll.u32 %s630_s5, 4  ;;  %s18_s30 = int_to_ptr.vmem [resolvable:$true] %s17_s30  ;;  %s42_s6 = int_to_ptr.vmem [resolvable:$true] %s41_s6 }
  0x14   :  { %s578_s9 = scalar_lea.hbm %s739_s0, 128 }
  0x15   :  { %p579_p8 = scmp.ne.s32.totalorder %s739_s0, %s578_s9  ;;  %p582_p9 = scmp.lt.u32.totalorder %s578_s9, %s739_s0 }
  0x17   :  { %p584_p10 = pnand %p582_p9, %p579_p8 }
  0x19   :  { %587 = shalt.err (!%p584_p10)
}
  0x1a   :  { %s588_s2 = scalar_lea.vmem %s18_s30, 128  ;;  %p593_p12 = scmp.lt.s32.totalorder %s18_s30, %s18_s30 }
  0x1b   :  { %p589_p11 = scmp.ne.s32.totalorder %s18_s30, %s588_s2  ;;  %p594_p13 = scmp.lt.s32.totalorder %s588_s2, %s588_s2 }
  0x1d   :  { %p595_p0 = por %p594_p13, %p593_p12 }
  0x1f   :  { %p596_p1 = pnand %p595_p0, %p589_p11 }
  0x21   :  { %599 = shalt.err (!%p596_p1)
}
  0x22   :  { %20 = dma.hbm_to_vmem [thread:$0]  %s739_s0, 128, %s18_s30, [#allocation3]  }
  0x23   :  { %s600_s18 = scalar_lea.hbm %s742_s3, 64 }
  0x24   :  { %p601_p2 = scmp.ne.s32.totalorder %s742_s3, %s600_s18  ;;  %p604_p3 = scmp.lt.u32.totalorder %s600_s18, %s742_s3 }
  0x26   :  { %p606_p4 = pnand %p604_p3, %p601_p2 }
  0x28   :  { %609 = shalt.err (!%p606_p4)
}
  0x29   :  { %s610_s23 = scalar_lea.vmem %s42_s6, 64  ;;  %p615_p6 = scmp.lt.s32.totalorder %s42_s6, %s42_s6 }
  0x2a   :  { %p611_p5 = scmp.ne.s32.totalorder %s42_s6, %s610_s23  ;;  %p616_p7 = scmp.lt.s32.totalorder %s610_s23, %s610_s23 }
  0x2c   :  { %p617_p8 = por %p616_p7, %p615_p6 }
  0x2e   :  { %p618_p9 = pnand %p617_p8, %p611_p5 }
  0x30   :  { %621 = shalt.err (!%p618_p9)
}
  0x31   :  { %44 = dma.hbm_to_vmem [thread:$0]  %s742_s3, 64, %s42_s6, [#allocation5]  }
  0x32   :  { %622 = dma.done.wait [#allocation3], 128  }
  0x33   :  { %623 = vsyncadd [#allocation3], 4294967168 }
  0x34   :  { %624 = dma.done.wait [#allocation5], 4416  }
  0x35   :  { %625 = vsyncadd [#allocation5], 4294962880  ;;  %v631_v0 = vmov 0.0|0.0   ;;  %vm632_vm0 = vmmov 0   ;;  %v633_v1 = vmov 0.0   ;;  %v56_v2 = vld [vmem:[#allocation4] sm:$0xff]  ;;  %v91_v30 = vlaneseq }
  0x36   :  { %491 = vmatprep.subr.bf16.mxu0 %v631_v0  ;;  %418 = vmatprep.mubr.msk.f32.mxu0 %vm632_vm0, %v633_v1  ;;  %v57_v3 = vld [vmem:[#allocation4 + $0x8] sm:$0xff]  ;;  %v58_v5 = vld [vmem:[#allocation4 + $0x10] sm:$0xff]  ;;  %v59_v6 = vld [vmem:[#allocation4 + $0x18] sm:$0xff]  ;;  %vm95_vm1 = vcmask 130048   ;;  %vm368_vm2 = vcmask 195584  }
  0x37   :  { %494 = vmatprep.subr.bf16.mxu1 %v631_v0  ;;  %453 = vmatprep.mubr.msk.f32.mxu1 %vm632_vm0, %v633_v1  ;;  %v492_v4 = vpack.c.bf16 %v57_v3, %v56_v2  ;;  %v60_v7 = vld [vmem:[#allocation4 + $0x20] sm:$0xff]  ;;  %v495_v8 = vpack.c.bf16 %v59_v6, %v58_v5  ;;  %v61_v9 = vld [vmem:[#allocation4 + $0x28] sm:$0xff]  ;;  %v54_v10 = vld [vmem:[#allocation2] sm:$0xff]  ;;  %v712_v31 = vshrl.u32 %v91_v30, 7 }
  0x38   :  { %v498_v11 = vpack.c.bf16 %v61_v9, %v60_v7  ;;  %v62_v12 = vld [vmem:[#allocation4 + $0x30] sm:$0xff]  ;;  %v63_v13 = vld [vmem:[#allocation4 + $0x38] sm:$0xff]  ;;  %v64_v15 = vld [vmem:[#allocation4 + $0x40] sm:$0xff] }
  0x39   :  { %493 = vmatpush3.bf16.msra.mxu0 %v492_v4  ;;  %496 = vmatpush3.bf16.msra.mxu1 %v495_v8  ;;  %v501_v14 = vpack.c.bf16 %v63_v13, %v62_v12  ;;  %v65_v16 = vld [vmem:[#allocation4 + $0x48] sm:$0xff]  ;;  %v66_v18 = vld [vmem:[#allocation4 + $0x50] sm:$0xff]  ;;  %v67_v19 = vld [vmem:[#allocation4 + $0x58] sm:$0xff]  ;;  %v93_v32 = vsub.s32 0, %v712_v31 }
  0x3a   :  { %518 = vmatprep.subr.bf16.mxu0 %v631_v0  ;;  %497 = vmatprep.subr.bf16.mxu1 %v631_v0  ;;  %v504_v17 = vpack.c.bf16 %v65_v16, %v64_v15  ;;  %v507_v20 = vpack.c.bf16 %v67_v19, %v66_v18  ;;  %v68_v21 = vld [vmem:[#allocation4 + $0x60] sm:$0xff]  ;;  %v69_v22 = vld [vmem:[#allocation4 + $0x68] sm:$0xff]  ;;  %v70_v24 = vld [vmem:[#allocation4 + $0x70] sm:$0xff] }
  0x3b   :  { %v510_v23 = vpack.c.bf16 %v69_v22, %v68_v21  ;;  %v71_v25 = vld [vmem:[#allocation4 + $0x78] sm:$0xff]  ;;  %v72_v27 = vld [vmem:[#allocation4 + $0x80] sm:$0xff]  ;;  %v73_v28 = vld [vmem:[#allocation4 + $0x88] sm:$0xff]  ;;  %v267_v21 = vsub.s32 1, %v712_v31 }
  0x3c   :  { %419 = vmatmul.mubr.msk.f32.vlgmr.msra.gmra.mrb[0].mxu0 %vm95_vm1, %v54_v10  ;;  %v513_v26 = vpack.c.bf16 %v71_v25, %v70_v24  ;;  %v516_v29 = vpack.c.bf16 %v73_v28, %v72_v27  ;;  %v715_v33 = vld [vmem:[#allocation6] sm:$0xf]  ;;  %v75_v40 = vld [vmem:[#allocation4 + $0x98] sm:$0xff]  ;;  %v76_v42 = vld [vmem:[#allocation4 + $0xa0] sm:$0xff]  ;;  %v272_v25 = vsub.s32 2, %v712_v31 }
  0x3d   :  { %488 = vmatprep.mubr.msk.f32.mxu0 %vm632_vm0, %v633_v1  ;;  %499 = vmatpush3.bf16.msra.mxu1 %v498_v11  ;;  %v94_v34 = vrot.slane %v715_v33, %v93_v32  ;;  %v74_v39 = vld [vmem:[#allocation4 + $0x90] sm:$0xff]  ;;  %v77_v43 = vld [vmem:[#allocation4 + $0xa8] sm:$0xff]  ;;  %v79_v46 = vld [vmem:[#allocation4 + $0xb8] sm:$0xff]  ;;  %v278_v32 = vsub.s32 3, %v712_v31 }
  0x3e   :  { %500 = vmatprep.subr.bf16.mxu1 %v631_v0  ;;  %v519_v41 = vpack.c.bf16 %v75_v40, %v74_v39  ;;  %v522_v44 = vpack.c.bf16 %v77_v43, %v76_v42  ;;  %v78_v45 = vld [vmem:[#allocation4 + $0xb0] sm:$0xff]  ;;  %v80_v48 = vld [vmem:[#allocation4 + $0xc0] sm:$0xff]  ;;  %v81_v49 = vld [vmem:[#allocation4 + $0xc8] sm:$0xff] }
  0x3f   :  { %v525_v47 = vpack.c.bf16 %v79_v46, %v78_v45  ;;  %v528_v50 = vpack.c.bf16 %v81_v49, %v80_v48  ;;  %v82_v51 = vld [vmem:[#allocation4 + $0xd0] sm:$0xff]  ;;  %v83_v52 = vld [vmem:[#allocation4 + $0xd8] sm:$0xff]  ;;  %v84_v54 = vld [vmem:[#allocation4 + $0xe0] sm:$0xff] }
  0x40   :  { %520 = vmatpush3.bf16.msra.mxu0 %v519_v41  ;;  %v531_v53 = vpack.c.bf16 %v83_v52, %v82_v51  ;;  %v85_v55 = vld [vmem:[#allocation4 + $0xe8] sm:$0xff]  ;;  %v86_v57 = vld [vmem:[#allocation4 + $0xf0] sm:$0xff]  ;;  %v87_v58 = vld [vmem:[#allocation4 + $0xf8] sm:$0xff] }
  0x41   :  { %502 = vmatpush3.bf16.msra.mxu1 %v501_v14  ;;  %521 = vmatprep.subr.bf16.mxu0 %v631_v0  ;;  %v534_v56 = vpack.c.bf16 %v85_v55, %v84_v54  ;;  %v537_v59 = vpack.c.bf16 %v87_v58, %v86_v57  ;;  %v88_v60 = vld [vmem:[#allocation4 + $0x100] sm:$0xff]  ;;  %v89_v61 = vld [vmem:[#allocation4 + $0x108] sm:$0xff] }
  0x42   :  { %503 = vmatprep.subr.bf16.mxu1 %v631_v0  ;;  %v540_v62 = vpack.c.bf16 %v89_v61, %v88_v60  ;;  %v55_v63 = vld [vmem:[%s740_s1] sm:$0xff]  ;;  %s634_s1 = smov 120  }
  0x43   :  { %354 = vrot.lane.b32.xlu0 %v55_v63, %s628_s26  ;;  %s635_s26 = smov 16  }
  0x44   :  { %523 = vmatpush3.bf16.msra.mxu0 %v522_v44 }
  0x45   :  { %505 = vmatpush3.bf16.msra.mxu1 %v504_v17  ;;  %524 = vmatprep.subr.bf16.mxu0 %v631_v0 }
  0x46   :  { %506 = vmatprep.subr.bf16.mxu1 %v631_v0 }
  0x48   :  { %526 = vmatpush3.bf16.msra.mxu0 %v525_v47 }
  0x49   :  { %508 = vmatpush3.bf16.msra.mxu1 %v507_v20  ;;  %527 = vmatprep.subr.bf16.mxu0 %v631_v0 }
  0x4a   :  { %509 = vmatprep.subr.bf16.mxu1 %v631_v0 }
  0x4c   :  { %529 = vmatpush3.bf16.msra.mxu0 %v528_v50 }
  0x4d   :  { %511 = vmatpush3.bf16.msra.mxu1 %v510_v23  ;;  %530 = vmatprep.subr.bf16.mxu0 %v631_v0 }
  0x4e   :  { %512 = vmatprep.subr.bf16.mxu1 %v631_v0 }
  0x50   :  { %532 = vmatpush3.bf16.msra.mxu0 %v531_v53 }
  0x51   :  { %514 = vmatpush3.bf16.msra.mxu1 %v513_v26  ;;  %533 = vmatprep.subr.bf16.mxu0 %v631_v0 }
  0x52   :  { %515 = vmatprep.subr.bf16.mxu1 %v631_v0 }
  0x54   :  { %535 = vmatpush3.bf16.msra.mxu0 %v534_v56 }
  0x55   :  { %517 = vmatpush3.bf16.msra.mxu1 %v516_v29  ;;  %536 = vmatprep.subr.bf16.mxu0 %v631_v0 }
  0x58   :  { %538 = vmatpush3.bf16.msra.mxu0 %v537_v59 }
  0x59   :  { %539 = vmatprep.subr.bf16.mxu0 %v631_v0 }
  0x5c   :  { %541 = vmatpush3.bf16.msra.mxu0 %v540_v62 }
  0xb5   :  { %v355_v40 = vpop.permute.xlu0 %354 }
 0x10f   :  { %v165_v35 = vpop.f32.mrb[0].mxu0 }
 0x110   :  { %v166_v36 = vadd.f32 %v165_v35, %v94_v34  ;;  %v420_v37 = vpop.f32.mrb[1].mxu0  ;;  %v279_v34 = vrot.slane %v715_v33, %v278_v32 }
 0x112   :  { %v169_v38 = vmax.f32 %v166_v36, 0.0 }
 0x114   :  { %454 = vmatmul.mubr.f32.vlgmr.msra.gmra.mrb[0].mxu1 %v169_v38 }
 0x1e7   :  { %v236_v1 = vpop.f32.mrb[0].mxu1 }
 0x1e8   :  { %v240_v2 = vrot.slane %v236_v1, 4  ;;  %v455_v3 = vpop.f32.mrb[1].mxu1 }
 0x1ea   :  { %v241_v4 = vadd.f32 %v240_v2, %v236_v1 }
 0x1ec   :  { %v242_v5 = vrot.slane %v241_v4, 2 }
 0x1ee   :  { %v243_v6 = vadd.f32 %v242_v5, %v241_v4 }
 0x1f0   :  { %v244_v7 = vrot.slane %v243_v6, 1 }
 0x1f2   :  { %v245_v8 = vadd.f32 %v244_v7, %v243_v6 }
 0x1f4   :  { %v247_v9 = vmul.f32 0.125, %v245_v8 }
 0x1f6   :  { %v248_v0 = vsub.f32 %v236_v1, %v247_v9 }
 0x1f8   :  { %v249_v10 = vmul.f32 %v248_v0, %v248_v0 }
 0x1fa   :  { %v250_v11 = vrot.slane %v249_v10, 4 }
 0x1fc   :  { %v251_v12 = vadd.f32 %v250_v11, %v249_v10 }
 0x1fe   :  { %v252_v13 = vrot.slane %v251_v12, 2 }
 0x200   :  { %v253_v14 = vadd.f32 %v252_v13, %v251_v12 }
 0x202   :  { %v254_v15 = vrot.slane %v253_v14, 1 }
 0x204   :  { %v255_v16 = vadd.f32 %v254_v15, %v253_v14 }
 0x206   :  { %v256_v17 = vmul.f32 0.125, %v255_v16 }
 0x208   :  { %v257_v18 = vadd.f32 1e-05, %v256_v17 }
 0x20a   :  { %552 = vrsqrt.f32 %v257_v18 }
 0x214   :  { %v553_v19 = vpop.eup %552 }
 0x215   :  { %v259_v20 = vmul.f32 %v553_v19, %v715_v33 }
 0x217   :  { %v260_v22 = vmul.f32 %v259_v20, %v247_v9  ;;  %v268_v24 = vrot.slane %v259_v20, %v267_v21 }
 0x219   :  { %v262_v23 = vrot.slane %v260_v22, 7  ;;  %v269_v27 = vmul.f32 %v268_v24, %v236_v1 }
 0x21b   :  { %v264_v26 = vsub.f32 %v715_v33, %v262_v23 }
 0x21d   :  { %v273_v28 = vrot.slane %v264_v26, %v272_v25 }
 0x21f   :  { %v274_v29 = vadd.f32 %v273_v28, %v269_v27 }
 0x221   :  { %v275_v30 = vmax.f32 %v274_v29, 0.0 }
 0x223   :  { %489 = vmatmul.mubr.f32.vlgmr.msra.gmra.mrb[2].mxu0 %v275_v30 }
 0x2f6   :  { %v346_v35 = vpop.f32.mrb[2].mxu0 }
 0x2f7   :  { %v347_v36 = vadd.f32 %v346_v35, %v279_v34  ;;  %v490_v37 = vpop.f32.mrb[3].mxu0 }
 0x2f9   :  { %v350_v38 = vmul.f32 0.5, %v347_v36 }
 0x2fb   :  { %v351_v39 = vmul.f32 1.442695, %v350_v38 }
 0x2fd   :  { %554 = vpow2.f32 %v351_v39 }
 0x307   :  { %v555_v41 = vpop.eup %554 }
 0x308   :  { %v357_v42 = vmul.f32 %v555_v41, %v355_v40 }
 0x30a   :  { %359 = vrot.lane.b32.xlu0 %v357_v42, %s634_s1 }
 0x37c   :  { %v360_v43 = vpop.permute.xlu0 %359 }
 0x37d   :  { %v362_v44 = vadd.f32 %v360_v43, %v347_v36 }
 0x37f   :  { %364 = vrot.lane.b32.xlu1 %v362_v44, %s635_s26 }
 0x3f1   :  { %v365_v45 = vpop.permute.xlu1 %364 }
 0x3f2   :  { %v367_v31 = vsel %vm95_vm1, %v347_v36, %v365_v45 }
 0x3f3   :  { %369 = vst.msk [vmem:[%s743_s4] sm:$0xff] %vm368_vm2, %v367_v31 }
 0x3f4   :  { %374 = vsyncpa [#allocation3], 1 }
 0x3f5   :  { %375 = vsyncpa [#allocation5], 1 }

</bundles_post_ra>
